<compile_context>
chip_gen: v6e
topology: v6e:2x2x1
jax: 0.10.0
libtpu: 0.0.40
codegen_flags: <defaults>
</compile_context>

<pallas_src>
import math
import functools

import jax
import jax.numpy as jnp
from jax.experimental import pallas as pl
from jax.experimental.pallas import tpu as pltpu


def _csin_kernel(x_ref, o_ref, *, w0, c):
    # x_ref: (1, C, L) VMEM block; o_ref: (1, 2C, L) VMEM block (L lane-dense).
    x = x_ref[...].astype(jnp.float32)
    scale = 1.0 / (w0 * math.sqrt(2.0))
    y = jnp.sin(x * w0) * scale                 # one sin; sin(-x) = -sin(x)
    o_ref[:, :c, :] = y.astype(o_ref.dtype)     # first C channels:  sin(x*w0)*s
    o_ref[:, c:, :] = (-y).astype(o_ref.dtype)  # last  C channels: -sin(x*w0)*s


def _pick_hw_block(hw, c, elem_bytes, target_bytes=4 << 20):
    """Largest spatial block (multiple of 128, dividing hw) whose
    (input + 2x output) working set stays around `target_bytes`."""
    if hw % 128 != 0:
        # Not lane-alignable: fall back to the full extent as a single block
        # (block dim equal to the array dim is always legal).
        return hw
    cap = max(128, (target_bytes // (3 * c * elem_bytes)) // 128 * 128)
    cap = min(cap, hw)
    blk = 128
    m = 128
    while m <= cap:
        if hw % m == 0:
            blk = m
        m += 128
    return blk


def csin(x, w0=1.0):
    """Pallas implementation of CSin.forward for NCHW input."""
    N, C, H, W = x.shape
    HW = H * W
    elem_bytes = jnp.dtype(x.dtype).itemsize

    # Lane-dense view: (N, C, H, W) -> (N, C, H*W); free reshape (contiguous).
    x2 = x.reshape(N, C, HW)
    hw_blk = _pick_hw_block(HW, C, elem_bytes)
    grid = (N, HW // hw_blk)

    kernel = functools.partial(_csin_kernel, w0=float(w0), c=C)
    out = pl.pallas_call(
        kernel,
        out_shape=jax.ShapeDtypeStruct((N, 2 * C, HW), x.dtype),
        grid=grid,
        in_specs=[pl.BlockSpec((1, C, hw_blk), lambda n, j: (n, 0, j))],
        out_specs=pl.BlockSpec((1, 2 * C, hw_blk), lambda n, j: (n, 0, j)),
        compiler_params=pltpu.CompilerParams(
            # Both axes fully independent -> shardable across TensorCores.
            dimension_semantics=("parallel", "parallel"),
        ),
    )(x2)
    return out.reshape(N, 2 * C, H, W)


def _csin_ref(x, w0):
    xc = jnp.concatenate([x, -x], axis=1)
    return jnp.sin(xc * w0) / (w0 * math.sqrt(2.0))


if __name__ == "__main__":
    key = jax.random.PRNGKey(0)
    x = jax.random.normal(key, (2, 4, 16, 16), dtype=jnp.float32)

    ok = True
    for w0 in (1.0, 30.0):
        y = jax.block_until_ready(csin(x, w0=w0))
        y_ref = _csin_ref(x, w0)
        ok &= y.shape == (2, 8, 16, 16)
        ok &= bool(jnp.allclose(y, y_ref, atol=1e-6, rtol=1e-6))

    assert ok
    print("KERNEL_OK")
</pallas_src>

<mosaic_0001>
module attributes {stable_mosaic.version = 11 : i64} {
  func.func @_csin_kernel(%arg0: i32, %arg1: i32, %arg2: memref<1x4x256xf32, #tpu.memory_space<vmem>>, %arg3: memref<1x8x256xf32, #tpu.memory_space<vmem>>) attributes {dimension_semantics = [#tpu.dimension_semantics<parallel>, #tpu.dimension_semantics<parallel>], iteration_bounds = array<i64: 2, 1>, scalar_prefetch = 0 : i64, scratch_operands = 0 : i64, tpu.core_type = #tpu.core_type<tc>, window_params = [{transform_indices = @transform_0, window_bounds = array<i64: 1, 4, 256>}, {transform_indices = @transform_1, window_bounds = array<i64: 1, 8, 256>}]} {
    %c0 = arith.constant 0 : index
    %c0_0 = arith.constant 0 : index
    %c0_1 = arith.constant 0 : index
    %0 = vector.load %arg2[%c0, %c0_0, %c0_1] : memref<1x4x256xf32, #tpu.memory_space<vmem>>, vector<1x4x256xf32>
    %cst = arith.constant 1.000000e+00 : f32
    %1 = vector.broadcast %cst : f32 to vector<1x4x256xf32>
    %2 = arith.mulf %0, %1 : vector<1x4x256xf32>
    %3 = math.sin %2 : vector<1x4x256xf32>
    %cst_2 = arith.constant 0.707106769 : f32
    %4 = vector.broadcast %cst_2 : f32 to vector<1x4x256xf32>
    %5 = arith.mulf %3, %4 : vector<1x4x256xf32>
    %c0_3 = arith.constant 0 : index
    %c0_4 = arith.constant 0 : index
    %c0_5 = arith.constant 0 : index
    %6 = vector.load %arg3[%c0_3, %c0_4, %c0_5] : memref<1x8x256xf32, #tpu.memory_space<vmem>>, vector<1x4x256xf32>
    tpu.vector_store %arg3[%c0_3, %c0_4, %c0_5], %5 {strides = array<i32>} : memref<1x8x256xf32, #tpu.memory_space<vmem>>, vector<1x4x256xf32>,
    %cst_6 = arith.constant 0.000000e+00 : f32
    %7 = vector.broadcast %cst_6 : f32 to vector<1x4x256xf32>
    %8 = arith.subf %7, %5 : vector<1x4x256xf32>
    %c0_7 = arith.constant 0 : index
    %c4 = arith.constant 4 : index
    %c0_8 = arith.constant 0 : index
    %9 = vector.load %arg3[%c0_7, %c4, %c0_8] : memref<1x8x256xf32, #tpu.memory_space<vmem>>, vector<1x4x256xf32>
    tpu.vector_store %arg3[%c0_7, %c4, %c0_8], %8 {strides = array<i32>} : memref<1x8x256xf32, #tpu.memory_space<vmem>>, vector<1x4x256xf32>,
    return
  }
  func.func @transform_0(%arg0: i32, %arg1: i32) -> (i32, i32, i32) {
    %c0_i32 = arith.constant 0 : i32
    %c0_i32_0 = arith.constant 0 : i32
    return %arg0, %c0_i32, %arg1 : i32, i32, i32
  }
  func.func @transform_1(%arg0: i32, %arg1: i32) -> (i32, i32, i32) {
    %c0_i32 = arith.constant 0 : i32
    %c0_i32_0 = arith.constant 0 : i32
    return %arg0, %c0_i32, %arg1 : i32, i32, i32
  }
}

</mosaic_0001>

<bundles_post_ra>
// kernel: tpu_custom_call.1
= control target key start
LH: loop header
LB: loop body
LE: loop exit
PB: predicated region body
PF: predicated region fallthrough
CT: control target
= control target key end

     0   :  { %6 = vsyncpa [#allocation3], 0  ;;  %s758_s0 = inlined_call_operand.hbm [shape: f32[2,4,256], index: 0, kind: input, shape index: {}]   ;;  %s759_s1 = inlined_call_operand.hbm [shape: f32[2,8,256], index: 1, kind: output, shape index: {}]  }
   0x1   :  { %8 = vsyncpa [#allocation3 + $0x1], 0 }
   0x2   :  { %9 = vsyncpa [#allocation4], 0 }
   0x3   :  { %11 = vsyncpa [#allocation4 + $0x1], 0  ;;  %s596_s6 = smov 0   ;;  %s598_s7 = smov 0  }
   0x4   :  { %s600_s8 = smov 0   ;;  %s602_s9 = smov 0  }
   0x5   :  { %s604_s10 = smov 0   ;;  %s606_s11 = smov 0  }
   0x6 LB: > { %s371_s12 = sadd.s32 4294967295, %s576_s11   ;;  %s372_s13 = sadd.s32 4294967294, %s576_s11   ;;  %s576_s11 = sphi %s606_s11, %s17_s11   ;;  %s572_s10 = sphi %s604_s10, %s771_s10   ;;  %s568_s9 = sphi %s602_s9, %s770_s9   ;;  %s564_s8 = sphi %s600_s8, %s769_s8   ;;  %s560_s7 = sphi %s598_s7, %s768_s7   ;;  %s556_s6 = sphi %s596_s6, %s767_s6  }
   0x7   : > { %s29_s14 = sadd.s32 1, %s572_s10  ;;  %s38_s15 = sadd.s32 1, %s564_s8 }
   0x8   : > { %p31_p0 = scmp.ge.s32.totalorder %s29_s14, 2  ;;  %p45_p1 = scmp.ne.s32.totalorder %s564_s8, %s560_s7 }
   0x9   : > { %p46_p2 = scmp.eq.s32.totalorder %s576_s11, 0  ;;  %p51_p3 = scmp.ne.s32.totalorder %s560_s7, %s556_s6 }
   0xa   : > { %s773_s14 = smov (%p31_p0, %s29_s14), 0  ;;  %p52_p5 = scmp.eq.s32.totalorder %s371_s12, 0 }
   0xb   : > { %p637_p4 = por %p46_p2, %p45_p1  ;;  %s33_s17 = ssub.s32 %s572_s10, %s773_s14 }
   0xc   : > { %p77_p6 = scmp.eq.s32.totalorder %s371_s12, 1  ;;  %p36_p7 = scmp.eq.s32.totalorder %s33_s17, 0 }
   0xd   : > { %p643_p8 = por %p52_p5, %p51_p3  ;;  %p83_p10 = scmp.eq.s32.totalorder %s372_s13, 1 }
   0xe   : > { %p647_p9 = por %p77_p6, %p45_p1  ;;  %p408_p13 = scmp.lt.s32.totalorder %s576_s11, 2 }
   0xf   : > { %s652_s20 = scalar_select %p36_p7, %s564_s8, %s38_s15  }
  0x10   : > { %p654_p11 = por %p83_p10, %p51_p3  ;;  %s103_s22 = sand.u32 1, %s564_s8  }
  0x11   : > { %s375_s23 = sshll.u32 %s103_s22, 3  ;;  %s390_s24 = sshll.u32 %s572_s10, 7 }
  0x12   : > { %s763_s21 = scalar_select %p654_p11, 1, 0 }
  0x13   : > { %s115_s27 = scalar_lea.hbm %s758_s0, %s390_s24  ;;  %s107_s28 = scalar_lea.vmem [#allocation2], %s375_s23 }
  0x14   : > { %s117_s29 = sshll.u32 %s107_s28, 4  ;;  %p667_p0 = pnand %p408_p13, %p637_p4  ;;  %s118_s29 = int_to_ptr.vmem [resolvable:$true] %s117_s29 }
  0x15   : > { %p378_p1 = scmp.ge.s32.totalorder %s576_s11, 1  ;;  %p122_p2 = scmp.lt.s32.totalorder %s576_s11, 3 }
  0x16   : > { %s104_s2 = scalar_lea.sflag [#allocation3], %s103_s22  ;;  %p470_p3 = pneg %p667_p0 }
  0x17   : > { %s481_s3 = scalar_lea.vmem %s118_s29, 128  ;;  %s578_s4 = smov [#allocation2]  }
  0x18   : > { %p482_p5 = scmp.ne.s32.totalorder %s118_s29, %s481_s3  ;;  %s486_s5 = sshll.u32 %s578_s4, 4  ;;  %s487_s5 = int_to_ptr.vmem [resolvable:$false] %s486_s5 }
  0x19   : > { %s488_s12 = scalar_lea.vmem %s487_s5, 256  ;;  %p489_p10 = scmp.lt.s32.totalorder %s118_s29, %s487_s5 }
  0x1a   : > { %p484_p6 = pnand %p482_p5, %p470_p3  ;;  %p490_p12 = scmp.lt.s32.totalorder %s488_s12, %s481_s3 }
  0x1c   : > { %p485_p7 = pneg %p484_p6  ;;  %p491_p4 = por %p490_p12, %p489_p10 }
  0x1e   : > { %p492_p13 = pnand %p491_p4, %p485_p7 }
  0x20   : > { %495 = shalt.err (!%p492_p13)
}
  0x21   : > { %403 = dma.hbm_to_vmem [thread:$0]  (!%p667_p0), %s115_s27, 128, %s118_s29, %s104_s2  }
  0x22   : > { %p123_p11 = pnand %p378_p1, %p122_p2 }
  0x23   : > { %s682_s13 = sand.u32 (!%p123_p11), 1, %s560_s7  }
  0x24   : > { %126 = sbr.rel (%p123_p11) target bundleno = 145 (0x91), region = 24  ;;  %s379_s15 = sshll.u32 (!%p123_p11), %s682_s13, 3 }
  0x25   : > { %s129_s16 = scalar_lea.sflag (!%p123_p11), [#allocation3], %s682_s13  ;;  %s132_s17 = scalar_lea.vmem (!%p123_p11), [#allocation2], %s379_s15 }
  0x29   : > { %547 = dma.done.wait (%p643_p8), %s129_s16, 128  }
  0x2a   : > { %549 = vsyncadd (%p643_p8), %s129_s16, 4294967168  ;;  %v690_v0 = vld [vmem:[%s132_s17] sm:$0xff]  ;;  %v579_v12 = vmov 683565275   ;;  %v580_v14 = vmov 2475754826  }
  0x2b   : > { %v157_v1 = vand.u32 2139095040, %v690_v0  ;;  %v154_v3 = vand.u32 2147483647, %v690_v0  ;;  %v581_v16 = vmov 2131351028   ;;  %vm156_vm7 = vcmp.lt.s32.totalorder %v690_v0, 0 }
  0x2c   : > { %v582_v18 = vmov 2102212464   ;;  %v583_v20 = vmov 920167782   ;;  %v584_v27 = vmov 1326507024   ;;  %vm246_vm12 = vweird.f32 %v690_v0 }
  0x2d   : > { %v158_v2 = vshrl.u32 %v157_v1, 23  ;;  %v161_v6 = vand.u32 8388607, %v154_v3  ;;  %vm155_vm8 = vcmp.le.f32.partialorder %v154_v3, 0.7853982  ;;  %s380_s18 = sshll.u32 %s682_s13, 4 }
  0x2e   : > { %s150_s22 = scalar_lea.vmem [#allocation5], %s380_s18  ;;  %s391_s24 = sshll.u32 %s568_s9, 8 }
  0x2f   : > { %v381_v4 = vadd.s32 4294967169, %v158_v2  ;;  %v162_v9 = vor.u32 8388608, %v161_v6  ;;  %s287_s23 = sshll.u32 %s150_s22, 4  ;;  %s285_s27 = scalar_lea.hbm %s759_s1, %s391_s24  ;;  %s713_s23 = int_to_ptr.vmem [resolvable:$true] %s287_s23 }
  0x30   : > { %s271_s28 = scalar_lea.sflag [#allocation4], %s682_s13  ;;  %s496_s29 = scalar_lea.vmem %s713_s23, 256 }
  0x31   : > { %v164_v5 = vadd.s32 1, %v381_v4  ;;  %v202_v29 = vshll.u32 %v162_v9, 8  ;;  %p497_p8 = scmp.ne.s32.totalorder %s713_s23, %s496_s29  ;;  %s585_s9 = smov [#allocation5]  }
  0x32   : > { %s500_s30 = sshll.u32 %s585_s9, 4  ;;  %s501_s30 = int_to_ptr.vmem [resolvable:$false] %s500_s30 }
  0x33   : > { %vm165_vm0 = vcmp.gt.s32.totalorder %v164_v5, 0  ;;  %p498_p11 = pnand %p497_p8, %p647_p9  ;;  %s502_s2 = scalar_lea.vmem %s501_s30, 512 }
  0x34   : > { %v166_v7 = vsel %vm165_vm0, %v164_v5, 0  ;;  %p503_p0 = scmp.lt.s32.totalorder %s713_s23, %s501_s30  ;;  %p504_p1 = scmp.lt.s32.totalorder %s502_s2, %s496_s29 }
  0x35   : > { %v168_v8 = vand.u32 31, %v166_v7  ;;  %v167_v10 = vshrl.u32 %v166_v7, 5  ;;  %p499_p12 = pneg %p498_p11 }
  0x36   : > { %p505_p2 = por %p504_p1, %p503_p0 }
  0x37   : > { %v169_v11 = vsub.s32 32, %v168_v8  ;;  %v171_v13 = vshll.u32 %v579_v12, %v168_v8  ;;  %v174_v15 = vshll.u32 %v580_v14, %v168_v8  ;;  %v177_v17 = vshll.u32 %v581_v16, %v168_v8 }
  0x38   : > { %v180_v19 = vshll.u32 %v582_v18, %v168_v8  ;;  %v183_v21 = vshll.u32 %v583_v20, %v168_v8  ;;  %vm186_vm1 = vcmp.lt.s32.totalorder %v167_v10, 1  ;;  %vm189_vm2 = vcmp.lt.s32.totalorder %v167_v10, 4  ;;  %p506_p3 = pnand %p505_p2, %p499_p12 }
  0x39   : > { %v170_v22 = vshrl.u32 %v579_v12, %v169_v11  ;;  %v172_v23 = vshrl.u32 %v580_v14, %v169_v11  ;;  %v175_v24 = vshrl.u32 %v581_v16, %v169_v11  ;;  %v178_v25 = vshrl.u32 %v582_v18, %v169_v11 }
  0x3a   : > { %v181_v26 = vshrl.u32 %v583_v20, %v169_v11  ;;  %v184_v28 = vshrl.u32 %v584_v27, %v169_v11  ;;  %vm187_vm3 = vcmp.lt.s32.totalorder %v167_v10, 2  ;;  %vm188_vm4 = vcmp.lt.s32.totalorder %v167_v10, 3 }
  0x3b   : > { %v173_v30 = vor.u32 %v172_v23, %v171_v13  ;;  %v176_v31 = vor.u32 %v175_v24, %v174_v15  ;;  %v179_v32 = vor.u32 %v178_v25, %v177_v17 }
  0x3c   : > { %v182_v33 = vor.u32 %v181_v26, %v180_v19  ;;  %v185_v34 = vor.u32 %v184_v28, %v183_v21 }
  0x3d   : > { %v190_v35 = vsel %vm186_vm1, %v170_v22, %v173_v30  ;;  %v191_v36 = vsel %vm189_vm2, %v179_v32, 2102212464  ;;  %v194_v37 = vsel %vm186_vm1, %v173_v30, %v176_v31  ;;  %v198_v38 = vsel %vm186_vm1, %v176_v31, %v179_v32 }
  0x3e   : > { %v192_v39 = vsel %vm188_vm4, %v176_v31, %v191_v36  ;;  %v195_v40 = vsel %vm189_vm2, %v182_v33, 920167782  ;;  %v199_v41 = vsel %vm189_vm2, %v185_v34, 1326507024 }
  0x3f   : > { %v196_v42 = vsel %vm188_vm4, %v179_v32, %v195_v40  ;;  %v200_v43 = vsel %vm188_vm4, %v182_v33, %v199_v41  ;;  %v193_v44 = vsel %vm187_vm3, %v190_v35, %v192_v39 }
  0x40   : > { %v197_v45 = vsel %vm187_vm3, %v194_v37, %v196_v42  ;;  %v201_v46 = vsel %vm187_vm3, %v198_v38, %v200_v43  ;;  %v209_v51 = vmul.u32 %v202_v29, %v193_v44 }
  0x41   : > { %v696_v47 = vmul.u32.u64.low %v202_v29, %v201_v46  ;;  %v697_v48 = vmul.u32.u64.high %v202_v29, %v201_v46, %v696_v47  ;;  %v699_v49 = vmul.u32.u64.low %v202_v29, %v197_v45  ;;  %v700_v50 = vmul.u32.u64.high %v202_v29, %v197_v45, %v699_v49 }
  0x43   : > { %vm211_vm5 = vc.u32 %v697_v48, %v699_v49  ;;  %v212_v52 = vadd.s32 1, %v700_v50  ;;  %v210_v63 = vadd.s32 %v699_v49, %v697_v48 }
  0x45   : > { %v213_v53 = vsel %vm211_vm5, %v212_v52, %v700_v50 }
  0x46   : > { %v214_v54 = vadd.s32 %v213_v53, %v209_v51 }
  0x48   : > { %v215_v55 = vadd.s32 536870912, %v214_v54 }
  0x4a   : > { %v216_v56 = vshrl.u32 %v215_v55, 30 }
  0x4c   : > { %v217_v57 = vshll.u32 %v216_v56, 30  ;;  %v240_v14 = vsub.s32 4, %v216_v56 }
  0x4e   : > { %v218_v58 = vsub.s32 %v214_v54, %v217_v57  ;;  %v241_v17 = vsel %vm156_vm7, %v240_v14, %v216_v56 }
  0x4f   : > { %v243_v19 = vsel %vm155_vm8, 0, %v241_v17 }
  0x50   : > { %v220_v59 = vsub.s32 0, %v218_v58  ;;  %v247_v20 = vadd.s32 3, %v243_v19 }
  0x52   : > { %v382_v60 = vmin.u32 %v220_v59, %v218_v58  ;;  %v248_v21 = vand.u32 3, %v247_v20 }
  0x54   : > { %v222_v61 = vclz %v382_v60  ;;  %vm253_vm9 = vcmp.eq.s32.totalorder %v248_v21, 2  ;;  %vm250_vm10 = vcmp.eq.s32.totalorder %v248_v21, 0  ;;  %vm249_vm11 = vcmp.lt.s32.totalorder %v248_v21, 2 }
  0x56   : > { %v383_v62 = vadd.s32 4294967294, %v222_v61 }
  0x58   : > { %vm384_vm6 = vcmp.lt.s32.totalorder %v383_v62, 0 }
  0x59   : > { %v225_v1 = vsel %vm384_vm6, 0, %v383_v62 }
  0x5a   : > { %v226_v2 = vsub.s32 32, %v225_v1  ;;  %v227_v4 = vshll.u32 %v218_v58, %v225_v1  ;;  %v230_v5 = vsub.s32 4294967266, %v225_v1 }
  0x5c   : > { %v228_v6 = vshrl.u32 %v210_v63, %v226_v2  ;;  %v231_v7 = vadd.s32 127, %v230_v5 }
  0x5e   : > { %v229_v8 = vor.u32 %v228_v6, %v227_v4  ;;  %v232_v9 = vshll.u32 %v231_v7, 23 }
  0x60   : > { %v233_v10 = vor.u32 4788187, %v232_v9  ;;  %v236_v11 = vcvt.s32.f32 %v229_v8 }
  0x62   : > { %v234_v12 = vand.u32 2147483647, %v233_v10 }
  0x64   : > { %v237_v13 = vmul.f32 %v236_v11, %v234_v12 }
  0x66   : > { %v238_v15 = vxor.u32 2147483648, %v237_v13 }
  0x68   : > { %v239_v16 = vsel %vm156_vm7, %v238_v15, %v237_v13 }
  0x69   : > { %v242_v18 = vsel %vm155_vm8, %v690_v0, %v239_v16 }
  0x6a   : > { %464 = vcosq.f32 %v242_v18 }
  0x6b   : > { %466 = vsinq.f32 %v242_v18 }
  0x77   : > { %v465_v22 = vpop.eup %464 }
  0x78   : > { %v467_v23 = vpop.eup %466  ;;  %v254_v24 = vxor.u32 2147483648, %v465_v22 }
  0x79   : > { %v251_v25 = vxor.u32 2147483648, %v467_v23 }
  0x7a   : > { %v255_v3 = vsel %vm253_vm9, %v254_v24, %v467_v23 }
  0x7b   : > { %v252_v26 = vsel %vm250_vm10, %v465_v22, %v251_v25 }
  0x7c   : > { %v256_v27 = vsel %vm249_vm11, %v252_v26, %v255_v3 }
  0x7d   : > { %v257_v28 = vsel %vm246_vm12, nan, %v256_v27 }
  0x7e   : > { %v258_v29 = vmul.f32 0.70710677, %v257_v28 }
  0x80   : > { %262 = vst [vmem:[%s150_s22] sm:$0xf] %v258_v29  ;;  %v260_v30 = vcombine.high %v258_v29, %v258_v29  ;;  %v264_v31 = vsub.f32 0.0, %v258_v29 }
  0x82   : > { %263 = vst [vmem:[%s150_s22 + $0x8] sm:$0xf] %v260_v30  ;;  %v266_v0 = vcombine.low %v264_v31, %v264_v31  ;;  %269 = vst [vmem:[%s150_s22 + $0x8] sm:$0xf0] %v264_v31 }
  0x84   : > { %268 = vst [vmem:[%s150_s22] sm:$0xf0] %v266_v0 }
  0x85   : > { %509 = shalt.err (!%p506_p3)
}
  0x86   : > { %s510_s3 = scalar_lea.hbm %s285_s27, 256  ;;  %s514_s12 = scalar_lea.hbm %s759_s1, 512 }
  0x87   : > { %p511_p5 = scmp.ne.s32.totalorder %s285_s27, %s510_s3  ;;  %p515_p10 = scmp.lt.s32.totalorder %s285_s27, %s759_s1 }
  0x88   : > { %p516_p4 = scmp.lt.s32.totalorder %s514_s12, %s510_s3 }
  0x89   : > { %p512_p6 = pnand %p511_p5, %p647_p9 }
  0x8a   : > { %p517_p13 = por %p516_p4, %p515_p10 }
  0x8b   : > { %p513_p7 = pneg %p512_p6 }
  0x8d   : > { %p518_p8 = pnand %p517_p13, %p513_p7 }
  0x8f   : > { %521 = shalt.err (!%p518_p8)
}
  0x90   : > { %398 = dma.vmem_to_hbm [thread:$0]  (%p647_p9), %s713_s23, 256, %s285_s27, %s271_s28  }
  0x91 PF: > { %s299_s16 = sand.u32 1, %s556_s6   ;;  %p765_p11 = scmp.ne.s32.totalorder %s763_s21, 0 }
  0x92   : > { %p766_p12 = scmp.ge.s32.totalorder %s576_s11, 2  ;;  %s300_s17 = scalar_lea.sflag [#allocation4], %s299_s16 }
  0x94   : > { %p405_p0 = pnand %p766_p12, %p765_p11 }
  0x96   : > { %p406_p1 = pneg %p405_p0 }
  0x98   : > { %551 = dma.done.wait (%p406_p1), %s300_s17, 256  }
  0x99   : > { %553 = vsyncadd (%p406_p1), %s300_s17, 4294967040  ;;  %s17_s11 = sadd.s32 1, %s576_s11   ;;  %s767_s6 = smov %s560_s7 }
  0x9a   : > { %p14_p2 = scmp.ge.s32.totalorder %s17_s11, 4   ;;  %s768_s7 = smov %s564_s8 }
  0x9b   : > { %s769_s8 = smov %s652_s20  ;;  %s770_s9 = smov %s572_s10 }
  0x9c   : > { %s771_s10 = smov %s773_s14  ;;  %16 = sbr.rel (!%p14_p2) target bundleno = 6 (0x6), region = 69 }
  0xa1   :  { %305 = vsyncpa [#allocation3], 1 }
  0xa2   :  { %307 = vsyncpa [#allocation3 + $0x1], 1 }
  0xa3   :  { %308 = vsyncpa [#allocation4], 1 }
  0xa4   :  { %310 = vsyncpa [#allocation4 + $0x1], 1 }

</bundles_post_ra>
